<compile_context>
chip_gen: v5e
topology: v5e:2x2
jax: 0.10.0
libtpu: 0.0.40
codegen_flags: <defaults>
</compile_context>

<pallas_src>
import functools
import math
from typing import NamedTuple, Tuple

import jax
import jax.numpy as jnp
from jax.experimental import pallas as pl
from jax.experimental.pallas import tpu as pltpu

BN_EPS = 1e-5

# MXU operand dtype: bf16 halves im2col HBM traffic and doubles MXU throughput
# on v5e/v6e/v7x; accumulation stays f32.  Set to jnp.float32 for bit-exact
# comparison against an f32 reference.
MXU_DTYPE = jnp.bfloat16

# Stay well under v7x's 64 MiB physical VMEM while raising the 16/32 MiB scoped
# defaults enough for 256-wide double-buffered tiles.
_VMEM_LIMIT_BYTES = 48 * 1024 * 1024

# K (contraction) sizes in this module are small; below this threshold the whole
# K stays in one VMEM block (no K grid axis, no accumulator, no K-padding pass).
_MAX_SINGLE_BLOCK_K = 4096


def _triple(x):
    if isinstance(x, int):
        return (x, x, x)
    return tuple(x)


def _round_up(x, m):
    return (x + m - 1) // m * m


def _pad_channels(c):
    """Channel padding carried through the layer: lane-dense (multiple of 128)
    when the overhead is modest, otherwise sublane-aligned (multiple of 8)."""
    c128 = _round_up(c, 128)
    if c128 <= (c * 3) // 2:
        return c128
    return _round_up(c, 8)


@functools.lru_cache(maxsize=None)
def _preferred_tn():
    # v5e's MXU is 4x128^2 — 256-wide N tiles buy nothing there.
    try:
        kind = jax.devices()[0].device_kind.lower()
    except Exception:
        return 256
    return 128 if ("v5 lite" in kind or "v5e" in kind or "v5lite" in kind) else 256


def _pick_tn(n):
    for cand in (_preferred_tn(), 256, 128):
        if n % cand == 0:
            return cand
    return n  # small non-128-multiple N: single full-width block


# ----------------------------- Pallas kernels ------------------------------

def _mm_epilogue_kernel(a_ref, b_ref, s_ref, t_ref, o_ref, *, relu):
    """out = act((A @ B) * scale + shift); whole K in one block."""
    acc = jnp.dot(a_ref[...], b_ref[...], preferred_element_type=jnp.float32)
    y = acc * s_ref[...] + t_ref[...]
    if relu:
        y = jnp.maximum(y, 0.0)
    o_ref[...] = y.astype(o_ref.dtype)


def _mm_epilogue_kernel_ktiled(a_ref, b_ref, s_ref, t_ref, o_ref, acc_ref, *, relu):
    """Large-K fallback: K-tiled accumulation, fused epilogue on the last k step."""
    @pl.when(pl.program_id(2) == 0)
    def _():
        acc_ref[...] = jnp.zeros_like(acc_ref)

    acc_ref[...] += jnp.dot(a_ref[...], b_ref[...],
                            preferred_element_type=jnp.float32)

    @pl.when(pl.program_id(2) == pl.num_programs(2) - 1)
    def _():
        y = acc_ref[...] * s_ref[...] + t_ref[...]
        if relu:
            y = jnp.maximum(y, 0.0)
        o_ref[...] = y.astype(o_ref.dtype)


def matmul_bias_act(a, b, scale, shift, *, relu, out_dtype=jnp.float32,
                    tm=256, tk=512):
    """act((A[M,K] @ B[K,N]) * scale[N] + shift[N]) with the affine/ReLU epilogue
    fused into the matmul.  N must already be 8/128-aligned (weights are padded
    once at pack time); M may be ragged (partial edge tile, writes dropped)."""
    M, K = a.shape
    Kb, N = b.shape
    assert K == Kb, (K, Kb)
    tn = _pick_tn(N)
    tm = min(tm, _round_up(M, 8))
    s2 = scale.reshape(1, N).astype(jnp.float32)
    t2 = shift.reshape(1, N).astype(jnp.float32)
    cost = pl.CostEstimate(
        flops=2 * M * N * K,
        transcendentals=0,
        bytes_accessed=(a.size * a.dtype.itemsize + b.size * b.dtype.itemsize
                        + M * N * jnp.dtype(out_dtype).itemsize))

    if K <= _MAX_SINGLE_BLOCK_K:
        # N innermost so each big A tile is DMA'd exactly once; small B re-read.
        grid = (pl.cdiv(M, tm), N // tn)
        return pl.pallas_call(
            functools.partial(_mm_epilogue_kernel, relu=relu),
            out_shape=jax.ShapeDtypeStruct((M, N), out_dtype),
            grid_spec=pltpu.PrefetchScalarGridSpec(
                num_scalar_prefetch=0,
                grid=grid,
                in_specs=[pl.BlockSpec((tm, K), lambda i, j: (i, 0)),
                          pl.BlockSpec((K, tn), lambda i, j: (0, j)),
                          pl.BlockSpec((1, tn), lambda i, j: (0, j)),
                          pl.BlockSpec((1, tn), lambda i, j: (0, j))],
                out_specs=pl.BlockSpec((tm, tn), lambda i, j: (i, j))),
            compiler_params=pltpu.CompilerParams(
                dimension_semantics=("parallel", "parallel"),
                vmem_limit_bytes=_VMEM_LIMIT_BYTES),
            cost_estimate=cost,
        )(a, b, s2, t2)

    # Large-K fallback (not hit by this module's conv shapes): pad K once.
    Kp = _round_up(K, tk)
    a_p = jnp.pad(a, ((0, 0), (0, Kp - K)))
    b_p = jnp.pad(b, ((0, Kp - K), (0, 0)))
    grid = (pl.cdiv(M, tm), N // tn, Kp // tk)
    return pl.pallas_call(
        functools.partial(_mm_epilogue_kernel_ktiled, relu=relu),
        out_shape=jax.ShapeDtypeStruct((M, N), out_dtype),
        grid_spec=pltpu.PrefetchScalarGridSpec(
            num_scalar_prefetch=0,
            grid=grid,
            in_specs=[pl.BlockSpec((tm, tk), lambda i, j, k: (i, k)),
                      pl.BlockSpec((tk, tn), lambda i, j, k: (k, j)),
                      pl.BlockSpec((1, tn), lambda i, j, k: (0, j)),
                      pl.BlockSpec((1, tn), lambda i, j, k: (0, j))],
            out_specs=pl.BlockSpec((tm, tn), lambda i, j, k: (i, j)),
            scratch_shapes=[pltpu.VMEM((tm, tn), jnp.float32)]),
        compiler_params=pltpu.CompilerParams(
            dimension_semantics=("parallel", "parallel", "arbitrary"),
            vmem_limit_bytes=_VMEM_LIMIT_BYTES),
        cost_estimate=cost,
    )(a_p, b_p, s2, t2)


# ------------------------------ conv wrappers -------------------------------

def conv_spatial_fused(x_cl, w2, scale, shift, kh, kw, sh, sw, ph, pw, *,
                       relu, out_dtype):
    """(1,kh,kw) conv over a channels-last activation with fused affine/ReLU.
    x_cl: (N, D, H, W, C); w2: (kh*kw*C, Np).  Returns (N, D, Ho, Wo, Np)."""
    n, d, h, w, c = x_cl.shape
    ho = (h + 2 * ph - kh) // sh + 1
    wo = (w + 2 * pw - kw) // sw + 1
    if kh == 1 and kw == 1 and ph == 0 and pw == 0:
        col = x_cl[:, :, ::sh, ::sw, :]
    else:
        xp = jnp.pad(x_cl, ((0, 0), (0, 0), (ph, ph), (pw, pw), (0, 0)))
        taps = [xp[:, :, ky:ky + sh * ho:sh, kx:kx + sw * wo:sw, :]
                for ky in range(kh) for kx in range(kw)]
        col = taps[0] if len(taps) == 1 else jnp.concatenate(taps, axis=-1)
    col2 = col.reshape(n * d * ho * wo, kh * kw * c)
    out = matmul_bias_act(col2, w2, scale, shift, relu=relu, out_dtype=out_dtype)
    return out.reshape(n, d, ho, wo, w2.shape[1])


def conv_temporal_fused(x_cl, w2, scale, shift, kt, st, pt, *, relu, out_dtype):
    """(kt,1,1) conv over a channels-last activation with fused affine.
    x_cl: (N, D, H, W, C); w2: (kt*C, Np).  Returns (N, Do, H, W, Np)."""
    n, d, h, w, c = x_cl.shape
    do = (d + 2 * pt - kt) // st + 1
    if kt == 1 and pt == 0:
        col = x_cl[:, ::st, :, :, :]
    else:
        xp = jnp.pad(x_cl, ((0, 0), (pt, pt), (0, 0), (0, 0), (0, 0)))
        taps = [xp[:, t:t + st * do:st, :, :, :] for t in range(kt)]
        col = taps[0] if len(taps) == 1 else jnp.concatenate(taps, axis=-1)
    col2 = col.reshape(n * do * h * w, kt * c)
    out = matmul_bias_act(col2, w2, scale, shift, relu=relu, out_dtype=out_dtype)
    return out.reshape(n, do, h, w, w2.shape[1])


# ------------------------------- parameters ---------------------------------

class STConfig(NamedTuple):
    in_channels: int
    out_channels: int
    kernel: Tuple[int, int, int]
    stride: Tuple[int, int, int]
    padding: Tuple[int, int, int]


def make_config(in_channels, out_channels, kernel_size, stride=1, padding=0):
    return STConfig(in_channels, out_channels,
                    _triple(kernel_size), _triple(stride), _triple(padding))


def intermed_channels(cfg):
    kt, kh, kw = cfg.kernel
    cin, cout = cfg.in_channels, cfg.out_channels
    return int(math.floor(kt * kh * kw * cin * cout /
                          (kh * kw * cin + kt * cout)))


def init_params(key, cfg, bias=True):
    """Raw parameters mirroring the PyTorch module (Conv3d-style uniform init)."""
    kt, kh, kw = cfg.kernel
    cin, cout = cfg.in_channels, cfg.out_channels
    mid = intermed_channels(cfg)
    k1, k2, k3, k4 = jax.random.split(key, 4)
    bnd_s = 1.0 / math.sqrt(cin * kh * kw)
    bnd_t = 1.0 / math.sqrt(mid * kt)
    ws = jax.random.uniform(k1, (mid, cin, 1, kh, kw), jnp.float32, -bnd_s, bnd_s)
    bs = (jax.random.uniform(k2, (mid,), jnp.float32, -bnd_s, bnd_s)
          if bias else jnp.zeros((mid,), jnp.float32))
    wt = jax.random.uniform(k3, (cout, mid, kt, 1, 1), jnp.float32, -bnd_t, bnd_t)
    bt = (jax.random.uniform(k4, (cout,), jnp.float32, -bnd_t, bnd_t)
          if bias else jnp.zeros((cout,), jnp.float32))
    bn = {'gamma': jnp.ones((mid,), jnp.float32),
          'beta': jnp.zeros((mid,), jnp.float32),
          'mean': jnp.zeros((mid,), jnp.float32),
          'var': jnp.ones((mid,), jnp.float32)}
    return {'ws': ws, 'bs': bs, 'bn': bn, 'wt': wt, 'bt': bt}


def pack_params(p, cfg, mxu_dtype=MXU_DTYPE):
    """One-time repack: matmul-layout weights, channel padding applied once,
    conv bias + eval-mode BatchNorm folded into the spatial epilogue affine."""
    kt, kh, kw = cfg.kernel
    mid, cin = p['ws'].shape[0], p['ws'].shape[1]
    cout = p['wt'].shape[0]
    midp = _pad_channels(mid)
    outp = _pad_channels(cout)

    # Spatial weight: (mid, cin, 1, kh, kw) -> (kh*kw*cin, midp); row order
    # matches the im2col tap order (ky, kx, c).
    w_s = jnp.transpose(p['ws'][:, :, 0, :, :], (2, 3, 1, 0)).reshape(kh * kw * cin, mid)
    w_s = jnp.pad(w_s, ((0, 0), (0, midp - mid))).astype(mxu_dtype)
    scale = p['bn']['gamma'] / jnp.sqrt(p['bn']['var'] + BN_EPS)
    shift = p['bn']['beta'] + scale * (p['bs'] - p['bn']['mean'])
    scale_s = jnp.pad(scale, (0, midp - mid))
    shift_s = jnp.pad(shift, (0, midp - mid))

    # Temporal weight: (cout, mid, kt, 1, 1) -> (kt*midp, outp); padded input
    # channels get zero rows so the carried channel padding is a no-op.
    w_t = jnp.transpose(p['wt'][:, :, :, 0, 0], (2, 1, 0))
    w_t = jnp.pad(w_t, ((0, 0), (0, midp - mid), (0, outp - cout)))
    w_t = w_t.reshape(kt * midp, outp).astype(mxu_dtype)
    scale_t = jnp.ones((outp,), jnp.float32)
    shift_t = jnp.pad(p['bt'], (0, outp - cout))

    return {'w_s': w_s, 'scale_s': scale_s, 'shift_s': shift_s,
            'w_t': w_t, 'scale_t': scale_t, 'shift_t': shift_t}


# -------------------------------- forward -----------------------------------

def spatio_temporal_conv(x, packed, cfg):
    """Forward pass matching SpatioTemporalConv: x NCDHW f32 -> NCDHW f32."""
    kt, kh, kw = cfg.kernel
    st, sh, sw = cfg.stride
    pt, ph, pw = cfg.padding
    # NCDHW -> channels-last once; C rides the lane dimension from here on.
    x_cl = jnp.transpose(x, (0, 2, 3, 4, 1)).astype(MXU_DTYPE)
    y = conv_spatial_fused(x_cl, packed['w_s'], packed['scale_s'],
                           packed['shift_s'], kh, kw, sh, sw, ph, pw,
                           relu=True, out_dtype=MXU_DTYPE)
    z = conv_temporal_fused(y, packed['w_t'], packed['scale_t'],
                            packed['shift_t'], kt, st, pt,
                            relu=False, out_dtype=jnp.float32)
    z = z[..., :cfg.out_channels]           # drop carried channel padding once
    return jnp.transpose(z, (0, 4, 1, 2, 3))  # back to NCDHW


# ---------------------------------- main -------------------------------------

if __name__ == "__main__":
    key = jax.random.PRNGKey(0)
    kp1, kp2, kx = jax.random.split(key, 3)

    # NCDHW input: batch=2, 4 channels, 8 frames, 16x16 spatial
    x = jax.random.normal(kx, (2, 4, 8, 16, 16), jnp.float32)

    # stride-1 padded 3x3x3 factored conv (a typical R(2+1)D block conv)
    cfg1 = make_config(4, 16, 3, stride=1, padding=1)
    packed1 = pack_params(init_params(kp1, cfg1), cfg1)
    fwd1 = jax.jit(functools.partial(spatio_temporal_conv, cfg=cfg1))
    out1 = jax.block_until_ready(fwd1(x, packed1))
    assert out1.shape == (2, 16, 8, 16, 16), out1.shape
    assert bool(jnp.all(jnp.isfinite(out1)))

    # stride-2 down-sampling variant (exercises spatial + temporal striding)
    cfg2 = make_config(4, 32, 3, stride=2, padding=1)
    packed2 = pack_params(init_params(kp2, cfg2), cfg2)
    fwd2 = jax.jit(functools.partial(spatio_temporal_conv, cfg=cfg2))
    out2 = jax.block_until_ready(fwd2(x, packed2))
    assert out2.shape == (2, 32, 4, 8, 8), out2.shape
    assert bool(jnp.all(jnp.isfinite(out2)))

    print("KERNEL_OK")
</pallas_src>

<mosaic_0001>
module attributes {stable_mosaic.version = 11 : i64} {
  func.func @_mm_epilogue_kernel(%arg0: i32, %arg1: i32, %arg2: memref<256x36xbf16, #tpu.memory_space<vmem>>, %arg3: memref<36x24xbf16, #tpu.memory_space<vmem>>, %arg4: memref<1x24xf32, #tpu.memory_space<vmem>>, %arg5: memref<1x24xf32, #tpu.memory_space<vmem>>, %arg6: memref<256x24xbf16, #tpu.memory_space<vmem>>) attributes {dimension_semantics = [#tpu.dimension_semantics<parallel>, #tpu.dimension_semantics<parallel>], iteration_bounds = array<i64: 16, 1>, scalar_prefetch = 0 : i64, scratch_operands = 0 : i64, tpu.core_type = #tpu.core_type<tc>, window_params = [{transform_indices = @transform_0, window_bounds = array<i64: 256, 36>}, {transform_indices = @transform_1, window_bounds = array<i64: 36, 24>}, {transform_indices = @transform_2, window_bounds = array<i64: 1, 24>}, {transform_indices = @transform_3, window_bounds = array<i64: 1, 24>}, {transform_indices = @transform_4, window_bounds = array<i64: 256, 24>}]} {
    %c0 = arith.constant 0 : index
    %c0_0 = arith.constant 0 : index
    %0 = vector.load %arg2[%c0, %c0_0] : memref<256x36xbf16, #tpu.memory_space<vmem>>, vector<256x36xbf16>
    %c0_1 = arith.constant 0 : index
    %c0_2 = arith.constant 0 : index
    %1 = vector.load %arg3[%c0_1, %c0_2] : memref<36x24xbf16, #tpu.memory_space<vmem>>, vector<36x24xbf16>
    %cst = arith.constant dense<0.000000e+00> : vector<256x24xf32>
    %2 = tpu.matmul %0, %1, %cst {dimension_numbers = #tpu.dot_dimension_numbers<[1], [0], [0], [1], [0, 0, 1, 1], [], []>} : vector<256x36xbf16>, vector<36x24xbf16>, vector<256x24xf32> -> vector<256x24xf32>
    %c0_3 = arith.constant 0 : index
    %c0_4 = arith.constant 0 : index
    %3 = vector.load %arg4[%c0_3, %c0_4] : memref<1x24xf32, #tpu.memory_space<vmem>>, vector<1x24xf32>
    %4 = vector.broadcast %3 : vector<1x24xf32> to vector<256x24xf32>
    %5 = arith.mulf %2, %4 : vector<256x24xf32>
    %c0_5 = arith.constant 0 : index
    %c0_6 = arith.constant 0 : index
    %6 = vector.load %arg5[%c0_5, %c0_6] : memref<1x24xf32, #tpu.memory_space<vmem>>, vector<1x24xf32>
    %7 = vector.broadcast %6 : vector<1x24xf32> to vector<256x24xf32>
    %8 = arith.addf %5, %7 : vector<256x24xf32>
    %cst_7 = arith.constant 0.000000e+00 : f32
    %9 = vector.broadcast %cst_7 : f32 to vector<256x24xf32>
    %10 = arith.maximumf %8, %9 : vector<256x24xf32>
    %11 = arith.truncf %10 : vector<256x24xf32> to vector<256x24xbf16>
    %c0_8 = arith.constant 0 : index
    %c0_9 = arith.constant 0 : index
    %12 = vector.load %arg6[%c0_8, %c0_9] : memref<256x24xbf16, #tpu.memory_space<vmem>>, vector<256x24xbf16>
    tpu.vector_store %arg6[%c0_8, %c0_9], %11 {strides = array<i32>} : memref<256x24xbf16, #tpu.memory_space<vmem>>, vector<256x24xbf16>,
    return
  }
  func.func @transform_0(%arg0: i32, %arg1: i32) -> (i32, i32) {
    %c0_i32 = arith.constant 0 : i32
    %c0_i32_0 = arith.constant 0 : i32
    return %arg0, %c0_i32 : i32, i32
  }
  func.func @transform_1(%arg0: i32, %arg1: i32) -> (i32, i32) {
    %c0_i32 = arith.constant 0 : i32
    %c0_i32_0 = arith.constant 0 : i32
    return %c0_i32, %arg1 : i32, i32
  }
  func.func @transform_2(%arg0: i32, %arg1: i32) -> (i32, i32) {
    %c0_i32 = arith.constant 0 : i32
    %c0_i32_0 = arith.constant 0 : i32
    return %c0_i32, %arg1 : i32, i32
  }
  func.func @transform_3(%arg0: i32, %arg1: i32) -> (i32, i32) {
    %c0_i32 = arith.constant 0 : i32
    %c0_i32_0 = arith.constant 0 : i32
    return %c0_i32, %arg1 : i32, i32
  }
  func.func @transform_4(%arg0: i32, %arg1: i32) -> (i32, i32) {
    %c0_i32 = arith.constant 0 : i32
    return %arg0, %arg1 : i32, i32
  }
}

module attributes {stable_mosaic.version = 11 : i64} {
  func.func @_mm_epilogue_kernel(%arg0: i32, %arg1: i32, %arg2: memref<256x72xbf16, #tpu.memory_space<vmem>>, %arg3: memref<72x16xbf16, #tpu.memory_space<vmem>>, %arg4: memref<1x16xf32, #tpu.memory_space<vmem>>, %arg5: memref<1x16xf32, #tpu.memory_space<vmem>>, %arg6: memref<256x16xf32, #tpu.memory_space<vmem>>) attributes {dimension_semantics = [#tpu.dimension_semantics<parallel>, #tpu.dimension_semantics<parallel>], iteration_bounds = array<i64: 16, 1>, scalar_prefetch = 0 : i64, scratch_operands = 0 : i64, tpu.core_type = #tpu.core_type<tc>, window_params = [{transform_indices = @transform_0, window_bounds = array<i64: 256, 72>}, {transform_indices = @transform_1, window_bounds = array<i64: 72, 16>}, {transform_indices = @transform_2, window_bounds = array<i64: 1, 16>}, {transform_indices = @transform_3, window_bounds = array<i64: 1, 16>}, {transform_indices = @transform_4, window_bounds = array<i64: 256, 16>}]} {
    %c0 = arith.constant 0 : index
    %c0_0 = arith.constant 0 : index
    %0 = vector.load %arg2[%c0, %c0_0] : memref<256x72xbf16, #tpu.memory_space<vmem>>, vector<256x72xbf16>
    %c0_1 = arith.constant 0 : index
    %c0_2 = arith.constant 0 : index
    %1 = vector.load %arg3[%c0_1, %c0_2] : memref<72x16xbf16, #tpu.memory_space<vmem>>, vector<72x16xbf16>
    %cst = arith.constant dense<0.000000e+00> : vector<256x16xf32>
    %2 = tpu.matmul %0, %1, %cst {dimension_numbers = #tpu.dot_dimension_numbers<[1], [0], [0], [1], [0, 0, 1, 1], [], []>} : vector<256x72xbf16>, vector<72x16xbf16>, vector<256x16xf32> -> vector<256x16xf32>
    %c0_3 = arith.constant 0 : index
    %c0_4 = arith.constant 0 : index
    %3 = vector.load %arg4[%c0_3, %c0_4] : memref<1x16xf32, #tpu.memory_space<vmem>>, vector<1x16xf32>
    %4 = vector.broadcast %3 : vector<1x16xf32> to vector<256x16xf32>
    %5 = arith.mulf %2, %4 : vector<256x16xf32>
    %c0_5 = arith.constant 0 : index
    %c0_6 = arith.constant 0 : index
    %6 = vector.load %arg5[%c0_5, %c0_6] : memref<1x16xf32, #tpu.memory_space<vmem>>, vector<1x16xf32>
    %7 = vector.broadcast %6 : vector<1x16xf32> to vector<256x16xf32>
    %8 = arith.addf %5, %7 : vector<256x16xf32>
    %c0_7 = arith.constant 0 : index
    %c0_8 = arith.constant 0 : index
    %9 = vector.load %arg6[%c0_7, %c0_8] : memref<256x16xf32, #tpu.memory_space<vmem>>, vector<256x16xf32>
    tpu.vector_store %arg6[%c0_7, %c0_8], %8 {strides = array<i32>} : memref<256x16xf32, #tpu.memory_space<vmem>>, vector<256x16xf32>,
    return
  }
  func.func @transform_0(%arg0: i32, %arg1: i32) -> (i32, i32) {
    %c0_i32 = arith.constant 0 : i32
    %c0_i32_0 = arith.constant 0 : i32
    return %arg0, %c0_i32 : i32, i32
  }
  func.func @transform_1(%arg0: i32, %arg1: i32) -> (i32, i32) {
    %c0_i32 = arith.constant 0 : i32
    %c0_i32_0 = arith.constant 0 : i32
    return %c0_i32, %arg1 : i32, i32
  }
  func.func @transform_2(%arg0: i32, %arg1: i32) -> (i32, i32) {
    %c0_i32 = arith.constant 0 : i32
    %c0_i32_0 = arith.constant 0 : i32
    return %c0_i32, %arg1 : i32, i32
  }
  func.func @transform_3(%arg0: i32, %arg1: i32) -> (i32, i32) {
    %c0_i32 = arith.constant 0 : i32
    %c0_i32_0 = arith.constant 0 : i32
    return %c0_i32, %arg1 : i32, i32
  }
  func.func @transform_4(%arg0: i32, %arg1: i32) -> (i32, i32) {
    %c0_i32 = arith.constant 0 : i32
    return %arg0, %arg1 : i32, i32
  }
}

</mosaic_0001>

<bundles_post_ra>
// kernel: spatio_temporal_conv.2
= control target key start
LH: loop header
LB: loop body
LE: loop exit
PB: predicated region body
PF: predicated region fallthrough
CT: control target
= control target key end

     0   :  { %s1028_s15 = smov 0   ;;  %s1030_s16 = smov 0   ;;  %s1251_s0 = inlined_call_operand.vmem [shape: bf16[4096,36], index: 0, kind: input, shape index: {}]   ;;  %s1252_s1 = inlined_call_operand.vmem [shape: bf16[36,24], index: 1, kind: input, shape index: {}]   ;;  %s1253_s2 = inlined_call_operand.vmem [shape: f32[1,24], index: 2, kind: input, shape index: {}]   ;;  %s1254_s3 = inlined_call_operand.vmem [shape: f32[1,24], index: 3, kind: input, shape index: {}]   ;;  %s1255_s4 = inlined_call_operand.vmem [shape: bf16[4096,24], index: 4, kind: output, shape index: {}]  }
   0x1   :  { %s1032_s17 = smov 0  }
   0x2 LB: > { %s26_s18 = sadd.s32 1, %s997_s16  ;;  %p831_p0 = scmp.ge.s32.totalorder %s1001_s17, 1  ;;  %s1001_s17 = sphi %s1032_s17, %s14_s17   ;;  %s997_s16 = sphi %s1030_s16, %s1257_s16   ;;  %s993_s15 = sphi %s1028_s15, %s1256_s15  }
   0x3   : > { %p28_p1 = scmp.ge.s32.totalorder %s26_s18, 16  ;;  %p202_p2 = scmp.lt.s32.totalorder %s1001_s17, 17 }
   0x5   : > { %s1259_s18 = smov (%p28_p1, %s26_s18), 0  ;;  %p203_p3 = pnand %p831_p0, %p202_p2 }
   0x6   : > { %s832_s21 = sshll.u32 (!%p203_p3), %s993_s15, 5 }
   0x7   : > { %206 = sbr.rel (%p203_p3) target bundleno = 228 (0xe4), region = 36  ;;  %p242_p4 = scmp.lt.s32.totalorder (!%p203_p3), %s832_s21, 511 }
   0xc   : > { %v303_v0 = vld [vmem:[%s1252_s1 + $0x10] sm:$0x3]  ;;  %vm448_vm0 = vcmask 1041408   ;;  %s1261_s21 = smov (!%p242_p4, %s832_s21), 511  ;;  %v943_v4 = vld [vmem:[%s1252_s1 + $0x8] sm:$0xff]  ;;  %v942_v5 = vld [vmem:[%s1252_s1] sm:$0xff] }
   0xd   : > { %v393_v1 = vunpack.c.l.b16 %v303_v0  ;;  %s833_s24 = sshll.u32 %s1261_s21, 2  ;;  %vm399_vm1 = vcmask 293888   ;;  %v1100_v22 = vld [vmem:[%s1253_s2] ss:$0 sm:$0xff]  ;;  %vm677_vm2 = vcmask 191488  }
   0xe   : > { %s1063_s29 = scalar_lea.vmem %s1251_s0, %s833_s24  ;;  %v1105_v23 = vld [vmem:[%s1254_s3] ss:$0 sm:$0xff]  ;;  %s1116_s10 = scalar_lea.vmem %s1255_s4, %s833_s24 }
   0xf   : > { %v396_v2 = vpack.c.b16 %v393_v1, %v393_v1  ;;  %v926_v6 = vld [vmem:[%s1063_s29] sm:$0xff]  ;;  %v927_v10 = vld [vmem:[%s1063_s29 + $0x8] sm:$0xff]  ;;  %v928_v14 = vld [vmem:[%s1063_s29 + $0x10] sm:$0xff] }
  0x10   : > { %v930_v7 = vld [vmem:[%s1063_s29 + $0x20] sm:$0xff]  ;;  %v931_v11 = vld [vmem:[%s1063_s29 + $0x28] sm:$0xff]  ;;  %v932_v15 = vld [vmem:[%s1063_s29 + $0x30] sm:$0xff] }
  0x11   : > { %v450_v3 = vsel %vm448_vm0, %v396_v2, 0  ;;  %v934_v8 = vld [vmem:[%s1063_s29 + $0x40] sm:$0xff]  ;;  %v935_v12 = vld [vmem:[%s1063_s29 + $0x48] sm:$0xff]  ;;  %v936_v16 = vld [vmem:[%s1063_s29 + $0x50] sm:$0xff] }
  0x12   : > { %457 = vmatpush.bf16.msra.mxu0 %v450_v3  ;;  %944 = vmatpush.bf16.msra.mxu1 %v450_v3  ;;  %v938_v9 = vld [vmem:[%s1063_s29 + $0x60] sm:$0xff]  ;;  %v939_v13 = vld [vmem:[%s1063_s29 + $0x68] sm:$0xff]  ;;  %v940_v17 = vld [vmem:[%s1063_s29 + $0x70] sm:$0xff] }
  0x13   : > { %945 = vmatpush.bf16.msra.mxu2 %v450_v3  ;;  %946 = vmatpush.bf16.msra.mxu3 %v450_v3  ;;  %v929_v18 = vld [vmem:[%s1063_s29 + $0x18] sm:$0xff] }
  0x14   : > { %v933_v19 = vld [vmem:[%s1063_s29 + $0x38] sm:$0xff] }
  0x15   : > { %v937_v20 = vld [vmem:[%s1063_s29 + $0x58] sm:$0xff] }
  0x16   : > { %458 = vmatpush.bf16.msra.mxu0 %v943_v4  ;;  %947 = vmatpush.bf16.msra.mxu1 %v943_v4  ;;  %v941_v21 = vld [vmem:[%s1063_s29 + $0x78] sm:$0xff] }
  0x17   : > { %948 = vmatpush.bf16.msra.mxu2 %v943_v4  ;;  %949 = vmatpush.bf16.msra.mxu3 %v943_v4 }
  0x1a   : > { %459 = vmatpush.bf16.msra.mxu0 %v942_v5  ;;  %950 = vmatpush.bf16.msra.mxu1 %v942_v5 }
  0x1b   : > { %951 = vmatpush.bf16.msra.mxu2 %v942_v5  ;;  %952 = vmatpush.bf16.msra.mxu3 %v942_v5 }
  0x1d   : > { %908 = vmatmul.msk.bf16.vlgmr.msra.gmra.mxu0 %vm399_vm1, %v926_v6  ;;  %912 = vmatmul.msk.bf16.vlgmr.msra.gmra.mxu1 %vm399_vm1, %v930_v7 }
  0x1e   : > { %916 = vmatmul.msk.bf16.vlgmr.msra.gmra.mxu2 %vm399_vm1, %v934_v8  ;;  %920 = vmatmul.msk.bf16.vlgmr.msra.gmra.mxu3 %vm399_vm1, %v938_v9 }
  0x2d   : > { %909 = vmatmul.msk.bf16.gmra.mxu0 %vm399_vm1, %v927_v10  ;;  %913 = vmatmul.msk.bf16.gmra.mxu1 %vm399_vm1, %v931_v11 }
  0x2e   : > { %917 = vmatmul.msk.bf16.gmra.mxu2 %vm399_vm1, %v935_v12  ;;  %921 = vmatmul.msk.bf16.gmra.mxu3 %vm399_vm1, %v939_v13 }
  0x3d   : > { %910 = vmatmul.msk.bf16.gmra.mxu0 %vm399_vm1, %v928_v14  ;;  %914 = vmatmul.msk.bf16.gmra.mxu1 %vm399_vm1, %v932_v15 }
  0x3e   : > { %918 = vmatmul.msk.bf16.gmra.mxu2 %vm399_vm1, %v936_v16  ;;  %922 = vmatmul.msk.bf16.gmra.mxu3 %vm399_vm1, %v940_v17 }
  0x4d   : > { %911 = vmatmul.msk.bf16.gmra.mxu0 %vm399_vm1, %v929_v18  ;;  %915 = vmatmul.msk.bf16.gmra.mxu1 %vm399_vm1, %v933_v19 }
  0x4e   : > { %919 = vmatmul.msk.bf16.gmra.mxu2 %vm399_vm1, %v937_v20  ;;  %923 = vmatmul.msk.bf16.gmra.mxu3 %vm399_vm1, %v941_v21 }
  0x9a   : > { %v461_v24 = vpop.f32.mrf.mxu0  ;;  %v481_v25 = vpop.f32.mrf.mxu1 }
  0x9b   : > { %v545_v26 = vmul.f32 %v1100_v22, %v461_v24  ;;  %v553_v27 = vmul.f32 %v1100_v22, %v481_v25 }
  0x9d   : > { %v581_v28 = vadd.f32 %v1105_v23, %v545_v26  ;;  %v589_v29 = vadd.f32 %v1105_v23, %v553_v27 }
  0x9f   : > { %v613_v30 = vmax.f32 %v581_v28, 0.0  ;;  %v621_v31 = vmax.f32 %v589_v29, 0.0 }
  0xa1   : > { %v645_v32 = vpack.c.bf16 %v613_v30, %v613_v30  ;;  %v653_v33 = vpack.c.bf16 %v621_v31, %v621_v31  ;;  %v501_v34 = vpop.f32.mrf.mxu2  ;;  %v521_v35 = vpop.f32.mrf.mxu3 }
  0xa2   : > { %v561_v36 = vmul.f32 %v1100_v22, %v501_v34  ;;  %v569_v37 = vmul.f32 %v1100_v22, %v521_v35  ;;  %v463_v38 = vpop.f32.mrf.mxu0  ;;  %v483_v39 = vpop.f32.mrf.mxu1 }
  0xa3   : > { %678 = vst.msk [vmem:[%s1116_s10] sm:$0xf] %vm677_vm2, %v645_v32  ;;  %v546_v40 = vmul.f32 %v1100_v22, %v463_v38  ;;  %v554_v41 = vmul.f32 %v1100_v22, %v483_v39 }
  0xa4   : > { %686 = vst.msk [vmem:[%s1116_s10 + $0x20] sm:$0xf] %vm677_vm2, %v653_v33  ;;  %v597_v42 = vadd.f32 %v1105_v23, %v561_v36  ;;  %v605_v43 = vadd.f32 %v1105_v23, %v569_v37 }
  0xa5   : > { %v582_v44 = vadd.f32 %v1105_v23, %v546_v40  ;;  %v590_v45 = vadd.f32 %v1105_v23, %v554_v41 }
  0xa6   : > { %v629_v46 = vmax.f32 %v597_v42, 0.0  ;;  %v637_v47 = vmax.f32 %v605_v43, 0.0 }
  0xa7   : > { %v614_v48 = vmax.f32 %v582_v44, 0.0  ;;  %v622_v49 = vmax.f32 %v590_v45, 0.0 }
  0xa8   : > { %v661_v50 = vpack.c.bf16 %v629_v46, %v629_v46  ;;  %v669_v51 = vpack.c.bf16 %v637_v47, %v637_v47 }
  0xa9   : > { %v646_v52 = vpack.c.bf16 %v614_v48, %v614_v48  ;;  %v654_v53 = vpack.c.bf16 %v622_v49, %v622_v49  ;;  %v503_v54 = vpop.f32.mrf.mxu2  ;;  %v523_v55 = vpop.f32.mrf.mxu3 }
  0xaa   : > { %694 = vst.msk [vmem:[%s1116_s10 + $0x40] sm:$0xf] %vm677_vm2, %v661_v50  ;;  %v562_v56 = vmul.f32 %v1100_v22, %v503_v54  ;;  %v570_v57 = vmul.f32 %v1100_v22, %v523_v55  ;;  %v466_v58 = vpop.f32.mrf.mxu0  ;;  %v486_v59 = vpop.f32.mrf.mxu1 }
  0xab   : > { %702 = vst.msk [vmem:[%s1116_s10 + $0x60] sm:$0xf] %vm677_vm2, %v669_v51  ;;  %v547_v60 = vmul.f32 %v1100_v22, %v466_v58  ;;  %v555_v61 = vmul.f32 %v1100_v22, %v486_v59 }
  0xac   : > { %679 = vst.msk [vmem:[%s1116_s10 + $0x4] sm:$0xf] %vm677_vm2, %v646_v52  ;;  %v598_v62 = vadd.f32 %v1105_v23, %v562_v56  ;;  %v606_v63 = vadd.f32 %v1105_v23, %v570_v57 }
  0xad   : > { %687 = vst.msk [vmem:[%s1116_s10 + $0x24] sm:$0xf] %vm677_vm2, %v654_v53  ;;  %v583_v0 = vadd.f32 %v1105_v23, %v547_v60  ;;  %v591_v1 = vadd.f32 %v1105_v23, %v555_v61 }
  0xae   : > { %v630_v2 = vmax.f32 %v598_v62, 0.0  ;;  %v638_v3 = vmax.f32 %v606_v63, 0.0 }
  0xaf   : > { %v615_v4 = vmax.f32 %v583_v0, 0.0  ;;  %v623_v5 = vmax.f32 %v591_v1, 0.0 }
  0xb0   : > { %v662_v6 = vpack.c.bf16 %v630_v2, %v630_v2  ;;  %v670_v7 = vpack.c.bf16 %v638_v3, %v638_v3 }
  0xb1   : > { %v647_v8 = vpack.c.bf16 %v615_v4, %v615_v4  ;;  %v655_v9 = vpack.c.bf16 %v623_v5, %v623_v5  ;;  %v506_v10 = vpop.f32.mrf.mxu2  ;;  %v526_v11 = vpop.f32.mrf.mxu3 }
  0xb2   : > { %695 = vst.msk [vmem:[%s1116_s10 + $0x44] sm:$0xf] %vm677_vm2, %v662_v6  ;;  %v563_v12 = vmul.f32 %v1100_v22, %v506_v10  ;;  %v571_v13 = vmul.f32 %v1100_v22, %v526_v11  ;;  %v468_v14 = vpop.f32.mrf.mxu0  ;;  %v488_v15 = vpop.f32.mrf.mxu1 }
  0xb3   : > { %703 = vst.msk [vmem:[%s1116_s10 + $0x64] sm:$0xf] %vm677_vm2, %v670_v7  ;;  %v548_v16 = vmul.f32 %v1100_v22, %v468_v14  ;;  %v556_v17 = vmul.f32 %v1100_v22, %v488_v15 }
  0xb4   : > { %680 = vst.msk [vmem:[%s1116_s10 + $0x8] sm:$0xf] %vm677_vm2, %v647_v8  ;;  %v599_v18 = vadd.f32 %v1105_v23, %v563_v12  ;;  %v607_v19 = vadd.f32 %v1105_v23, %v571_v13 }
  0xb5   : > { %688 = vst.msk [vmem:[%s1116_s10 + $0x28] sm:$0xf] %vm677_vm2, %v655_v9  ;;  %v584_v20 = vadd.f32 %v1105_v23, %v548_v16  ;;  %v592_v21 = vadd.f32 %v1105_v23, %v556_v17 }
  0xb6   : > { %v631_v24 = vmax.f32 %v599_v18, 0.0  ;;  %v639_v25 = vmax.f32 %v607_v19, 0.0 }
  0xb7   : > { %v616_v26 = vmax.f32 %v584_v20, 0.0  ;;  %v624_v27 = vmax.f32 %v592_v21, 0.0 }
  0xb8   : > { %v663_v28 = vpack.c.bf16 %v631_v24, %v631_v24  ;;  %v671_v29 = vpack.c.bf16 %v639_v25, %v639_v25 }
  0xb9   : > { %v648_v30 = vpack.c.bf16 %v616_v26, %v616_v26  ;;  %v656_v31 = vpack.c.bf16 %v624_v27, %v624_v27  ;;  %v508_v32 = vpop.f32.mrf.mxu2  ;;  %v528_v33 = vpop.f32.mrf.mxu3 }
  0xba   : > { %696 = vst.msk [vmem:[%s1116_s10 + $0x48] sm:$0xf] %vm677_vm2, %v663_v28  ;;  %v564_v34 = vmul.f32 %v1100_v22, %v508_v32  ;;  %v572_v35 = vmul.f32 %v1100_v22, %v528_v33  ;;  %v471_v36 = vpop.f32.mrf.mxu0  ;;  %v491_v37 = vpop.f32.mrf.mxu1 }
  0xbb   : > { %704 = vst.msk [vmem:[%s1116_s10 + $0x68] sm:$0xf] %vm677_vm2, %v671_v29  ;;  %v549_v38 = vmul.f32 %v1100_v22, %v471_v36  ;;  %v557_v39 = vmul.f32 %v1100_v22, %v491_v37 }
  0xbc   : > { %681 = vst.msk [vmem:[%s1116_s10 + $0xc] sm:$0xf] %vm677_vm2, %v648_v30  ;;  %v600_v40 = vadd.f32 %v1105_v23, %v564_v34  ;;  %v608_v41 = vadd.f32 %v1105_v23, %v572_v35 }
  0xbd   : > { %689 = vst.msk [vmem:[%s1116_s10 + $0x2c] sm:$0xf] %vm677_vm2, %v656_v31  ;;  %v585_v42 = vadd.f32 %v1105_v23, %v549_v38  ;;  %v593_v43 = vadd.f32 %v1105_v23, %v557_v39 }
  0xbe   : > { %v632_v44 = vmax.f32 %v600_v40, 0.0  ;;  %v640_v45 = vmax.f32 %v608_v41, 0.0 }
  0xbf   : > { %v617_v46 = vmax.f32 %v585_v42, 0.0  ;;  %v625_v47 = vmax.f32 %v593_v43, 0.0 }
  0xc0   : > { %v664_v48 = vpack.c.bf16 %v632_v44, %v632_v44  ;;  %v672_v49 = vpack.c.bf16 %v640_v45, %v640_v45 }
  0xc1   : > { %v649_v50 = vpack.c.bf16 %v617_v46, %v617_v46  ;;  %v657_v51 = vpack.c.bf16 %v625_v47, %v625_v47  ;;  %v511_v52 = vpop.f32.mrf.mxu2  ;;  %v531_v53 = vpop.f32.mrf.mxu3 }
  0xc2   : > { %697 = vst.msk [vmem:[%s1116_s10 + $0x4c] sm:$0xf] %vm677_vm2, %v664_v48  ;;  %v565_v54 = vmul.f32 %v1100_v22, %v511_v52  ;;  %v573_v55 = vmul.f32 %v1100_v22, %v531_v53  ;;  %v473_v56 = vpop.f32.mrf.mxu0  ;;  %v493_v57 = vpop.f32.mrf.mxu1 }
  0xc3   : > { %705 = vst.msk [vmem:[%s1116_s10 + $0x6c] sm:$0xf] %vm677_vm2, %v672_v49  ;;  %v550_v58 = vmul.f32 %v1100_v22, %v473_v56  ;;  %v558_v59 = vmul.f32 %v1100_v22, %v493_v57 }
  0xc4   : > { %682 = vst.msk [vmem:[%s1116_s10 + $0x10] sm:$0xf] %vm677_vm2, %v649_v50  ;;  %v601_v60 = vadd.f32 %v1105_v23, %v565_v54  ;;  %v609_v61 = vadd.f32 %v1105_v23, %v573_v55 }
  0xc5   : > { %690 = vst.msk [vmem:[%s1116_s10 + $0x30] sm:$0xf] %vm677_vm2, %v657_v51  ;;  %v586_v62 = vadd.f32 %v1105_v23, %v550_v58  ;;  %v594_v63 = vadd.f32 %v1105_v23, %v558_v59 }
  0xc6   : > { %v633_v0 = vmax.f32 %v601_v60, 0.0  ;;  %v641_v1 = vmax.f32 %v609_v61, 0.0 }
  0xc7   : > { %v618_v2 = vmax.f32 %v586_v62, 0.0  ;;  %v626_v3 = vmax.f32 %v594_v63, 0.0 }
  0xc8   : > { %v665_v4 = vpack.c.bf16 %v633_v0, %v633_v0  ;;  %v673_v5 = vpack.c.bf16 %v641_v1, %v641_v1 }
  0xc9   : > { %v650_v6 = vpack.c.bf16 %v618_v2, %v618_v2  ;;  %v658_v7 = vpack.c.bf16 %v626_v3, %v626_v3  ;;  %v513_v8 = vpop.f32.mrf.mxu2  ;;  %v533_v9 = vpop.f32.mrf.mxu3 }
  0xca   : > { %698 = vst.msk [vmem:[%s1116_s10 + $0x50] sm:$0xf] %vm677_vm2, %v665_v4  ;;  %v566_v10 = vmul.f32 %v1100_v22, %v513_v8  ;;  %v574_v11 = vmul.f32 %v1100_v22, %v533_v9  ;;  %v476_v12 = vpop.f32.mrf.mxu0  ;;  %v496_v13 = vpop.f32.mrf.mxu1 }
  0xcb   : > { %706 = vst.msk [vmem:[%s1116_s10 + $0x70] sm:$0xf] %vm677_vm2, %v673_v5  ;;  %v551_v14 = vmul.f32 %v1100_v22, %v476_v12  ;;  %v559_v15 = vmul.f32 %v1100_v22, %v496_v13 }
  0xcc   : > { %683 = vst.msk [vmem:[%s1116_s10 + $0x14] sm:$0xf] %vm677_vm2, %v650_v6  ;;  %v602_v16 = vadd.f32 %v1105_v23, %v566_v10  ;;  %v610_v17 = vadd.f32 %v1105_v23, %v574_v11 }
  0xcd   : > { %691 = vst.msk [vmem:[%s1116_s10 + $0x34] sm:$0xf] %vm677_vm2, %v658_v7  ;;  %v587_v18 = vadd.f32 %v1105_v23, %v551_v14  ;;  %v595_v19 = vadd.f32 %v1105_v23, %v559_v15 }
  0xce   : > { %v634_v20 = vmax.f32 %v602_v16, 0.0  ;;  %v642_v21 = vmax.f32 %v610_v17, 0.0 }
  0xcf   : > { %v619_v24 = vmax.f32 %v587_v18, 0.0  ;;  %v627_v25 = vmax.f32 %v595_v19, 0.0 }
  0xd0   : > { %v666_v26 = vpack.c.bf16 %v634_v20, %v634_v20  ;;  %v674_v27 = vpack.c.bf16 %v642_v21, %v642_v21 }
  0xd1   : > { %v651_v28 = vpack.c.bf16 %v619_v24, %v619_v24  ;;  %v659_v29 = vpack.c.bf16 %v627_v25, %v627_v25  ;;  %v516_v30 = vpop.f32.mrf.mxu2  ;;  %v536_v31 = vpop.f32.mrf.mxu3 }
  0xd2   : > { %699 = vst.msk [vmem:[%s1116_s10 + $0x54] sm:$0xf] %vm677_vm2, %v666_v26  ;;  %v567_v32 = vmul.f32 %v1100_v22, %v516_v30  ;;  %v575_v33 = vmul.f32 %v1100_v22, %v536_v31  ;;  %v478_v34 = vpop.f32.mrf.mxu0  ;;  %v498_v35 = vpop.f32.mrf.mxu1 }
  0xd3   : > { %707 = vst.msk [vmem:[%s1116_s10 + $0x74] sm:$0xf] %vm677_vm2, %v674_v27  ;;  %v552_v36 = vmul.f32 %v1100_v22, %v478_v34  ;;  %v560_v37 = vmul.f32 %v1100_v22, %v498_v35 }
  0xd4   : > { %684 = vst.msk [vmem:[%s1116_s10 + $0x18] sm:$0xf] %vm677_vm2, %v651_v28  ;;  %v603_v38 = vadd.f32 %v1105_v23, %v567_v32  ;;  %v611_v39 = vadd.f32 %v1105_v23, %v575_v33 }
  0xd5   : > { %692 = vst.msk [vmem:[%s1116_s10 + $0x38] sm:$0xf] %vm677_vm2, %v659_v29  ;;  %v588_v40 = vadd.f32 %v1105_v23, %v552_v36  ;;  %v596_v41 = vadd.f32 %v1105_v23, %v560_v37 }
  0xd6   : > { %v635_v42 = vmax.f32 %v603_v38, 0.0  ;;  %v643_v43 = vmax.f32 %v611_v39, 0.0 }
  0xd7   : > { %v620_v44 = vmax.f32 %v588_v40, 0.0  ;;  %v628_v45 = vmax.f32 %v596_v41, 0.0 }
  0xd8   : > { %v667_v46 = vpack.c.bf16 %v635_v42, %v635_v42  ;;  %v675_v47 = vpack.c.bf16 %v643_v43, %v643_v43 }
  0xd9   : > { %v652_v48 = vpack.c.bf16 %v620_v44, %v620_v44  ;;  %v660_v49 = vpack.c.bf16 %v628_v45, %v628_v45  ;;  %v518_v50 = vpop.f32.mrf.mxu2  ;;  %v538_v51 = vpop.f32.mrf.mxu3 }
  0xda   : > { %700 = vst.msk [vmem:[%s1116_s10 + $0x58] sm:$0xf] %vm677_vm2, %v667_v46  ;;  %v568_v52 = vmul.f32 %v1100_v22, %v518_v50  ;;  %v576_v53 = vmul.f32 %v1100_v22, %v538_v51 }
  0xdb   : > { %708 = vst.msk [vmem:[%s1116_s10 + $0x78] sm:$0xf] %vm677_vm2, %v675_v47 }
  0xdc   : > { %685 = vst.msk [vmem:[%s1116_s10 + $0x1c] sm:$0xf] %vm677_vm2, %v652_v48  ;;  %v604_v54 = vadd.f32 %v1105_v23, %v568_v52  ;;  %v612_v55 = vadd.f32 %v1105_v23, %v576_v53 }
  0xdd   : > { %693 = vst.msk [vmem:[%s1116_s10 + $0x3c] sm:$0xf] %vm677_vm2, %v660_v49 }
  0xde   : > { %v636_v56 = vmax.f32 %v604_v54, 0.0  ;;  %v644_v57 = vmax.f32 %v612_v55, 0.0 }
  0xe0   : > { %v668_v58 = vpack.c.bf16 %v636_v56, %v636_v56  ;;  %v676_v59 = vpack.c.bf16 %v644_v57, %v644_v57 }
  0xe2   : > { %701 = vst.msk [vmem:[%s1116_s10 + $0x5c] sm:$0xf] %vm677_vm2, %v668_v58 }
  0xe3   : > { %709 = vst.msk [vmem:[%s1116_s10 + $0x7c] sm:$0xf] %vm677_vm2, %v676_v59 }
  0xe4 PF: > { %s14_s17 = sadd.s32 1, %s1001_s17   ;;  %s1256_s15 = smov %s997_s16 }
  0xe5   : > { %p11_p5 = scmp.ge.s32.totalorder %s14_s17, 18   ;;  %s1257_s16 = smov %s1259_s18 }
  0xe7   :  { %13 = sbr.rel (!%p11_p5) target bundleno = 2 (0x2), region = 75 }

// kernel: spatio_temporal_conv.3
= control target key start
LH: loop header
LB: loop body
LE: loop exit
PB: predicated region body
PF: predicated region fallthrough
CT: control target
= control target key end

     0   :  { %s996_s15 = smov 0   ;;  %s998_s16 = smov 0   ;;  %s1222_s0 = inlined_call_operand.vmem [shape: bf16[4096,72], index: 0, kind: input, shape index: {}]   ;;  %s1223_s1 = inlined_call_operand.vmem [shape: bf16[72,16], index: 1, kind: input, shape index: {}]   ;;  %s1224_s2 = inlined_call_operand.vmem [shape: f32[1,16], index: 2, kind: input, shape index: {}]   ;;  %s1225_s3 = inlined_call_operand.vmem [shape: f32[1,16], index: 3, kind: input, shape index: {}]   ;;  %s1226_s4 = inlined_call_operand.vmem [shape: f32[4096,16], index: 4, kind: output, shape index: {}]  }
   0x1   :  { %s1000_s17 = smov 0  }
   0x2 LB: > { %s26_s18 = sadd.s32 1, %s965_s16  ;;  %p783_p0 = scmp.ge.s32.totalorder %s969_s17, 1  ;;  %s969_s17 = sphi %s1000_s17, %s14_s17   ;;  %s965_s16 = sphi %s998_s16, %s1228_s16   ;;  %s961_s15 = sphi %s996_s15, %s1227_s15  }
   0x3   : > { %p28_p1 = scmp.ge.s32.totalorder %s26_s18, 16  ;;  %p202_p2 = scmp.lt.s32.totalorder %s969_s17, 17 }
   0x5   : > { %s1230_s18 = smov (%p28_p1, %s26_s18), 0  ;;  %p203_p3 = pnand %p783_p0, %p202_p2 }
   0x6   : > { %s784_s21 = sshll.u32 (!%p203_p3), %s961_s15, 5 }
   0x7   : > { %206 = sbr.rel (%p203_p3) target bundleno = 232 (0xe8), region = 36  ;;  %p242_p4 = scmp.lt.s32.totalorder (!%p203_p3), %s784_s21, 511 }
   0xc   : > { %v307_v0 = vld [vmem:[%s1223_s1 + $0x20] sm:$0xf]  ;;  %vm464_vm0 = vcmask 1043456   ;;  %v905_v4 = vld [vmem:[%s1223_s1 + $0x18] sm:$0xff]  ;;  %v904_v5 = vld [vmem:[%s1223_s1 + $0x10] sm:$0xff]  ;;  %s1232_s21 = smov (!%p242_p4, %s784_s21), 511 }
   0xd   : > { %v405_v1 = vunpack.c.l.b16 %v307_v0  ;;  %v903_v6 = vld [vmem:[%s1223_s1 + $0x8] sm:$0xff]  ;;  %s785_s28 = sshll.u32 %s1232_s21, 2  ;;  %v902_v7 = vld [vmem:[%s1223_s1] sm:$0xff]  ;;  %vm415_vm1 = vcmask 588800   ;;  %s787_s10 = sshll.u32 %s1232_s21, 3  ;;  %vm629_vm2 = vcmask 130048  }
   0xe   : > { %s1035_s7 = scalar_lea.vmem %s1222_s0, %s785_s28  ;;  %v1072_v24 = vld [vmem:[%s1224_s2] ss:$0 sm:$0xff]  ;;  %s1085_s15 = scalar_lea.vmem %s1226_s4, %s787_s10 }
   0xf   : > { %v410_v2 = vpack.c.b16 %v405_v1, %v405_v1  ;;  %v886_v8 = vld [vmem:[%s1035_s7] sm:$0xff]  ;;  %v887_v12 = vld [vmem:[%s1035_s7 + $0x8] sm:$0xff]  ;;  %v888_v16 = vld [vmem:[%s1035_s7 + $0x10] sm:$0xff] }
  0x10   : > { %v890_v9 = vld [vmem:[%s1035_s7 + $0x20] sm:$0xff]  ;;  %v891_v13 = vld [vmem:[%s1035_s7 + $0x28] sm:$0xff]  ;;  %v892_v17 = vld [vmem:[%s1035_s7 + $0x30] sm:$0xff] }
  0x11   : > { %v466_v3 = vsel %vm464_vm0, %v410_v2, 0  ;;  %v894_v10 = vld [vmem:[%s1035_s7 + $0x40] sm:$0xff]  ;;  %v895_v14 = vld [vmem:[%s1035_s7 + $0x48] sm:$0xff]  ;;  %v896_v18 = vld [vmem:[%s1035_s7 + $0x50] sm:$0xff] }
  0x12   : > { %471 = vmatpush.bf16.msra.mxu0 %v466_v3  ;;  %906 = vmatpush.bf16.msra.mxu1 %v466_v3  ;;  %v898_v11 = vld [vmem:[%s1035_s7 + $0x60] sm:$0xff]  ;;  %v899_v15 = vld [vmem:[%s1035_s7 + $0x68] sm:$0xff]  ;;  %v900_v19 = vld [vmem:[%s1035_s7 + $0x70] sm:$0xff] }
  0x13   : > { %907 = vmatpush.bf16.msra.mxu2 %v466_v3  ;;  %908 = vmatpush.bf16.msra.mxu3 %v466_v3  ;;  %v889_v20 = vld [vmem:[%s1035_s7 + $0x18] sm:$0xff]  ;;  %v1078_v25 = vld [vmem:[%s1225_s3] ss:$0 sm:$0xff] }
  0x14   : > { %v893_v21 = vld [vmem:[%s1035_s7 + $0x38] sm:$0xff] }
  0x15   : > { %v897_v22 = vld [vmem:[%s1035_s7 + $0x58] sm:$0xff] }
  0x16   : > { %472 = vmatpush.bf16.msra.mxu0 %v905_v4  ;;  %909 = vmatpush.bf16.msra.mxu1 %v905_v4  ;;  %v901_v23 = vld [vmem:[%s1035_s7 + $0x78] sm:$0xff] }
  0x17   : > { %910 = vmatpush.bf16.msra.mxu2 %v905_v4  ;;  %911 = vmatpush.bf16.msra.mxu3 %v905_v4 }
  0x1a   : > { %473 = vmatpush.bf16.msra.mxu0 %v904_v5  ;;  %912 = vmatpush.bf16.msra.mxu1 %v904_v5 }
  0x1b   : > { %913 = vmatpush.bf16.msra.mxu2 %v904_v5  ;;  %914 = vmatpush.bf16.msra.mxu3 %v904_v5 }
  0x1e   : > { %474 = vmatpush.bf16.msra.mxu0 %v903_v6  ;;  %915 = vmatpush.bf16.msra.mxu1 %v903_v6 }
  0x1f   : > { %916 = vmatpush.bf16.msra.mxu2 %v903_v6  ;;  %917 = vmatpush.bf16.msra.mxu3 %v903_v6 }
  0x22   : > { %475 = vmatpush.bf16.msra.mxu0 %v902_v7  ;;  %918 = vmatpush.bf16.msra.mxu1 %v902_v7 }
  0x23   : > { %919 = vmatpush.bf16.msra.mxu2 %v902_v7  ;;  %920 = vmatpush.bf16.msra.mxu3 %v902_v7 }
  0x25   : > { %868 = vmatmul.msk.bf16.vlgmr.msra.gmra.mxu0 %vm415_vm1, %v886_v8  ;;  %872 = vmatmul.msk.bf16.vlgmr.msra.gmra.mxu1 %vm415_vm1, %v890_v9 }
  0x26   : > { %876 = vmatmul.msk.bf16.vlgmr.msra.gmra.mxu2 %vm415_vm1, %v894_v10  ;;  %880 = vmatmul.msk.bf16.vlgmr.msra.gmra.mxu3 %vm415_vm1, %v898_v11 }
  0x35   : > { %869 = vmatmul.msk.bf16.gmra.mxu0 %vm415_vm1, %v887_v12  ;;  %873 = vmatmul.msk.bf16.gmra.mxu1 %vm415_vm1, %v891_v13 }
  0x36   : > { %877 = vmatmul.msk.bf16.gmra.mxu2 %vm415_vm1, %v895_v14  ;;  %881 = vmatmul.msk.bf16.gmra.mxu3 %vm415_vm1, %v899_v15 }
  0x45   : > { %870 = vmatmul.msk.bf16.gmra.mxu0 %vm415_vm1, %v888_v16  ;;  %874 = vmatmul.msk.bf16.gmra.mxu1 %vm415_vm1, %v892_v17 }
  0x46   : > { %878 = vmatmul.msk.bf16.gmra.mxu2 %vm415_vm1, %v896_v18  ;;  %882 = vmatmul.msk.bf16.gmra.mxu3 %vm415_vm1, %v900_v19 }
  0x55   : > { %871 = vmatmul.msk.bf16.gmra.mxu0 %vm415_vm1, %v889_v20  ;;  %875 = vmatmul.msk.bf16.gmra.mxu1 %vm415_vm1, %v893_v21 }
  0x56   : > { %879 = vmatmul.msk.bf16.gmra.mxu2 %vm415_vm1, %v897_v22  ;;  %883 = vmatmul.msk.bf16.gmra.mxu3 %vm415_vm1, %v901_v23 }
  0xa2   : > { %v477_v26 = vpop.f32.mrf.mxu0  ;;  %v497_v27 = vpop.f32.mrf.mxu1 }
  0xa3   : > { %v561_v28 = vmul.f32 %v1072_v24, %v477_v26  ;;  %v569_v29 = vmul.f32 %v1072_v24, %v497_v27 }
  0xa5   : > { %v597_v30 = vadd.f32 %v1078_v25, %v561_v28  ;;  %v605_v31 = vadd.f32 %v1078_v25, %v569_v29 }
  0xa7   : > { %630 = vst.msk [vmem:[%s1085_s15] sm:$0xff] %vm629_vm2, %v597_v30 }
  0xa8   : > { %638 = vst.msk [vmem:[%s1085_s15 + $0x40] sm:$0xff] %vm629_vm2, %v605_v31 }
  0xa9   : > { %v517_v32 = vpop.f32.mrf.mxu2  ;;  %v537_v33 = vpop.f32.mrf.mxu3 }
  0xaa   : > { %v577_v34 = vmul.f32 %v1072_v24, %v517_v32  ;;  %v585_v35 = vmul.f32 %v1072_v24, %v537_v33  ;;  %v479_v36 = vpop.f32.mrf.mxu0  ;;  %v499_v37 = vpop.f32.mrf.mxu1 }
  0xab   : > { %v562_v38 = vmul.f32 %v1072_v24, %v479_v36  ;;  %v570_v39 = vmul.f32 %v1072_v24, %v499_v37 }
  0xac   : > { %v613_v40 = vadd.f32 %v1078_v25, %v577_v34  ;;  %v621_v41 = vadd.f32 %v1078_v25, %v585_v35 }
  0xad   : > { %v598_v42 = vadd.f32 %v1078_v25, %v562_v38  ;;  %v606_v43 = vadd.f32 %v1078_v25, %v570_v39 }
  0xae   : > { %646 = vst.msk [vmem:[%s1085_s15 + $0x80] sm:$0xff] %vm629_vm2, %v613_v40 }
  0xaf   : > { %654 = vst.msk [vmem:[%s1085_s15 + $0xc0] sm:$0xff] %vm629_vm2, %v621_v41 }
  0xb0   : > { %631 = vst.msk [vmem:[%s1085_s15 + $0x8] sm:$0xff] %vm629_vm2, %v598_v42 }
  0xb1   : > { %639 = vst.msk [vmem:[%s1085_s15 + $0x48] sm:$0xff] %vm629_vm2, %v606_v43  ;;  %v519_v44 = vpop.f32.mrf.mxu2  ;;  %v539_v45 = vpop.f32.mrf.mxu3 }
  0xb2   : > { %v578_v46 = vmul.f32 %v1072_v24, %v519_v44  ;;  %v586_v47 = vmul.f32 %v1072_v24, %v539_v45  ;;  %v482_v48 = vpop.f32.mrf.mxu0  ;;  %v502_v49 = vpop.f32.mrf.mxu1 }
  0xb3   : > { %v563_v50 = vmul.f32 %v1072_v24, %v482_v48  ;;  %v571_v51 = vmul.f32 %v1072_v24, %v502_v49 }
  0xb4   : > { %v614_v52 = vadd.f32 %v1078_v25, %v578_v46  ;;  %v622_v53 = vadd.f32 %v1078_v25, %v586_v47 }
  0xb5   : > { %v599_v54 = vadd.f32 %v1078_v25, %v563_v50  ;;  %v607_v55 = vadd.f32 %v1078_v25, %v571_v51 }
  0xb6   : > { %647 = vst.msk [vmem:[%s1085_s15 + $0x88] sm:$0xff] %vm629_vm2, %v614_v52 }
  0xb7   : > { %655 = vst.msk [vmem:[%s1085_s15 + $0xc8] sm:$0xff] %vm629_vm2, %v622_v53 }
  0xb8   : > { %632 = vst.msk [vmem:[%s1085_s15 + $0x10] sm:$0xff] %vm629_vm2, %v599_v54 }
  0xb9   : > { %640 = vst.msk [vmem:[%s1085_s15 + $0x50] sm:$0xff] %vm629_vm2, %v607_v55  ;;  %v522_v56 = vpop.f32.mrf.mxu2  ;;  %v542_v57 = vpop.f32.mrf.mxu3 }
  0xba   : > { %v579_v58 = vmul.f32 %v1072_v24, %v522_v56  ;;  %v587_v59 = vmul.f32 %v1072_v24, %v542_v57  ;;  %v484_v60 = vpop.f32.mrf.mxu0  ;;  %v504_v61 = vpop.f32.mrf.mxu1 }
  0xbb   : > { %v564_v62 = vmul.f32 %v1072_v24, %v484_v60  ;;  %v572_v63 = vmul.f32 %v1072_v24, %v504_v61 }
  0xbc   : > { %v615_v0 = vadd.f32 %v1078_v25, %v579_v58  ;;  %v623_v1 = vadd.f32 %v1078_v25, %v587_v59 }
  0xbd   : > { %v600_v2 = vadd.f32 %v1078_v25, %v564_v62  ;;  %v608_v3 = vadd.f32 %v1078_v25, %v572_v63 }
  0xbe   : > { %648 = vst.msk [vmem:[%s1085_s15 + $0x90] sm:$0xff] %vm629_vm2, %v615_v0 }
  0xbf   : > { %656 = vst.msk [vmem:[%s1085_s15 + $0xd0] sm:$0xff] %vm629_vm2, %v623_v1 }
  0xc0   : > { %633 = vst.msk [vmem:[%s1085_s15 + $0x18] sm:$0xff] %vm629_vm2, %v600_v2 }
  0xc1   : > { %641 = vst.msk [vmem:[%s1085_s15 + $0x58] sm:$0xff] %vm629_vm2, %v608_v3  ;;  %v524_v4 = vpop.f32.mrf.mxu2  ;;  %v544_v5 = vpop.f32.mrf.mxu3 }
  0xc2   : > { %v580_v6 = vmul.f32 %v1072_v24, %v524_v4  ;;  %v588_v7 = vmul.f32 %v1072_v24, %v544_v5  ;;  %v487_v8 = vpop.f32.mrf.mxu0  ;;  %v507_v9 = vpop.f32.mrf.mxu1 }
  0xc3   : > { %v565_v10 = vmul.f32 %v1072_v24, %v487_v8  ;;  %v573_v11 = vmul.f32 %v1072_v24, %v507_v9 }
  0xc4   : > { %v616_v12 = vadd.f32 %v1078_v25, %v580_v6  ;;  %v624_v13 = vadd.f32 %v1078_v25, %v588_v7 }
  0xc5   : > { %v601_v14 = vadd.f32 %v1078_v25, %v565_v10  ;;  %v609_v15 = vadd.f32 %v1078_v25, %v573_v11 }
  0xc6   : > { %649 = vst.msk [vmem:[%s1085_s15 + $0x98] sm:$0xff] %vm629_vm2, %v616_v12 }
  0xc7   : > { %657 = vst.msk [vmem:[%s1085_s15 + $0xd8] sm:$0xff] %vm629_vm2, %v624_v13 }
  0xc8   : > { %634 = vst.msk [vmem:[%s1085_s15 + $0x20] sm:$0xff] %vm629_vm2, %v601_v14 }
  0xc9   : > { %642 = vst.msk [vmem:[%s1085_s15 + $0x60] sm:$0xff] %vm629_vm2, %v609_v15  ;;  %v527_v16 = vpop.f32.mrf.mxu2  ;;  %v547_v17 = vpop.f32.mrf.mxu3 }
  0xca   : > { %v581_v18 = vmul.f32 %v1072_v24, %v527_v16  ;;  %v589_v19 = vmul.f32 %v1072_v24, %v547_v17  ;;  %v489_v20 = vpop.f32.mrf.mxu0  ;;  %v509_v21 = vpop.f32.mrf.mxu1 }
  0xcb   : > { %v566_v22 = vmul.f32 %v1072_v24, %v489_v20  ;;  %v574_v23 = vmul.f32 %v1072_v24, %v509_v21 }
  0xcc   : > { %v617_v26 = vadd.f32 %v1078_v25, %v581_v18  ;;  %v625_v27 = vadd.f32 %v1078_v25, %v589_v19 }
  0xcd   : > { %v602_v28 = vadd.f32 %v1078_v25, %v566_v22  ;;  %v610_v29 = vadd.f32 %v1078_v25, %v574_v23 }
  0xce   : > { %650 = vst.msk [vmem:[%s1085_s15 + $0xa0] sm:$0xff] %vm629_vm2, %v617_v26 }
  0xcf   : > { %658 = vst.msk [vmem:[%s1085_s15 + $0xe0] sm:$0xff] %vm629_vm2, %v625_v27 }
  0xd0   : > { %635 = vst.msk [vmem:[%s1085_s15 + $0x28] sm:$0xff] %vm629_vm2, %v602_v28 }
  0xd1   : > { %643 = vst.msk [vmem:[%s1085_s15 + $0x68] sm:$0xff] %vm629_vm2, %v610_v29  ;;  %v529_v30 = vpop.f32.mrf.mxu2  ;;  %v549_v31 = vpop.f32.mrf.mxu3 }
  0xd2   : > { %v582_v32 = vmul.f32 %v1072_v24, %v529_v30  ;;  %v590_v33 = vmul.f32 %v1072_v24, %v549_v31  ;;  %v492_v34 = vpop.f32.mrf.mxu0  ;;  %v512_v35 = vpop.f32.mrf.mxu1 }
  0xd3   : > { %v567_v36 = vmul.f32 %v1072_v24, %v492_v34  ;;  %v575_v37 = vmul.f32 %v1072_v24, %v512_v35 }
  0xd4   : > { %v618_v38 = vadd.f32 %v1078_v25, %v582_v32  ;;  %v626_v39 = vadd.f32 %v1078_v25, %v590_v33 }
  0xd5   : > { %v603_v40 = vadd.f32 %v1078_v25, %v567_v36  ;;  %v611_v41 = vadd.f32 %v1078_v25, %v575_v37 }
  0xd6   : > { %651 = vst.msk [vmem:[%s1085_s15 + $0xa8] sm:$0xff] %vm629_vm2, %v618_v38 }
  0xd7   : > { %659 = vst.msk [vmem:[%s1085_s15 + $0xe8] sm:$0xff] %vm629_vm2, %v626_v39 }
  0xd8   : > { %636 = vst.msk [vmem:[%s1085_s15 + $0x30] sm:$0xff] %vm629_vm2, %v603_v40 }
  0xd9   : > { %644 = vst.msk [vmem:[%s1085_s15 + $0x70] sm:$0xff] %vm629_vm2, %v611_v41  ;;  %v532_v42 = vpop.f32.mrf.mxu2  ;;  %v552_v43 = vpop.f32.mrf.mxu3 }
  0xda   : > { %v583_v44 = vmul.f32 %v1072_v24, %v532_v42  ;;  %v591_v45 = vmul.f32 %v1072_v24, %v552_v43  ;;  %v494_v46 = vpop.f32.mrf.mxu0  ;;  %v514_v47 = vpop.f32.mrf.mxu1 }
  0xdb   : > { %v568_v48 = vmul.f32 %v1072_v24, %v494_v46  ;;  %v576_v49 = vmul.f32 %v1072_v24, %v514_v47 }
  0xdc   : > { %v619_v50 = vadd.f32 %v1078_v25, %v583_v44  ;;  %v627_v51 = vadd.f32 %v1078_v25, %v591_v45 }
  0xdd   : > { %v604_v52 = vadd.f32 %v1078_v25, %v568_v48  ;;  %v612_v53 = vadd.f32 %v1078_v25, %v576_v49 }
  0xde   : > { %652 = vst.msk [vmem:[%s1085_s15 + $0xb0] sm:$0xff] %vm629_vm2, %v619_v50 }
  0xdf   : > { %660 = vst.msk [vmem:[%s1085_s15 + $0xf0] sm:$0xff] %vm629_vm2, %v627_v51 }
  0xe0   : > { %637 = vst.msk [vmem:[%s1085_s15 + $0x38] sm:$0xff] %vm629_vm2, %v604_v52 }
  0xe1   : > { %645 = vst.msk [vmem:[%s1085_s15 + $0x78] sm:$0xff] %vm629_vm2, %v612_v53  ;;  %v534_v54 = vpop.f32.mrf.mxu2  ;;  %v554_v55 = vpop.f32.mrf.mxu3 }
  0xe2   : > { %v584_v56 = vmul.f32 %v1072_v24, %v534_v54  ;;  %v592_v57 = vmul.f32 %v1072_v24, %v554_v55 }
  0xe4   : > { %v620_v58 = vadd.f32 %v1078_v25, %v584_v56  ;;  %v628_v59 = vadd.f32 %v1078_v25, %v592_v57 }
  0xe6   : > { %653 = vst.msk [vmem:[%s1085_s15 + $0xb8] sm:$0xff] %vm629_vm2, %v620_v58 }
  0xe7   : > { %661 = vst.msk [vmem:[%s1085_s15 + $0xf8] sm:$0xff] %vm629_vm2, %v628_v59 }
  0xe8 PF: > { %s14_s17 = sadd.s32 1, %s969_s17   ;;  %s1227_s15 = smov %s965_s16 }
  0xe9   : > { %p11_p5 = scmp.ge.s32.totalorder %s14_s17, 18   ;;  %s1228_s16 = smov %s1230_s18 }
  0xeb   :  { %13 = sbr.rel (!%p11_p5) target bundleno = 2 (0x2), region = 75 }

</bundles_post_ra>
